<compile_context>
chip_gen: v6e
topology: v6e:2x2x1
jax: 0.10.0
libtpu: 0.0.40
codegen_flags: <defaults>
</compile_context>

<pallas_src>
import math

import jax
import jax.numpy as jnp
from jax import lax
from jax.experimental import pallas as pl
from jax.experimental.pallas import tpu as pltpu


# ---------------------------------------------------------------------------
# Kernel: one (batch, head, q-tile, kv-tile) grid step.
# ---------------------------------------------------------------------------
def _flash_mhpa_kernel(xq_ref, xk_ref, xv_ref, w_ref, b_ref, o_ref,
                       q_ref, m_ref, l_ref, acc_ref):
    # xq_ref : (1, C, tq)    query activations (channels-first)
    # xk_ref : (1, C, tkv)   key   activations
    # xv_ref : (1, C, tkv)   value activations
    # w_ref  : (3, 1, d, C)  this head's [Wq*scale, Wk, Wv]
    # b_ref  : (3, 1, d, 1)  this head's [bq*scale, bk, bv]
    # o_ref  : (1, d, tq)    this head's output channel rows
    # q_ref  : (d, tq) f32   projected (pre-scaled) Q, computed once per q-tile
    # m_ref  : (1, tq) f32   online-softmax running max
    # l_ref  : (1, tq) f32   online-softmax running denominator
    # acc_ref: (d, tq) f32   online-softmax running numerator
    kv = pl.program_id(3)

    @pl.when(kv == 0)
    def _():
        # Project Q for this (batch, head, q-tile) once; reset running stats.
        q_ref[...] = (jnp.dot(w_ref[0, 0], xq_ref[0],
                              preferred_element_type=jnp.float32) + b_ref[0, 0])
        m_ref[...] = jnp.full_like(m_ref, -jnp.inf)
        l_ref[...] = jnp.zeros_like(l_ref)
        acc_ref[...] = jnp.zeros_like(acc_ref)

    # Project this KV tile: (d, C) @ (C, tkv) -> (d, tkv); contraction over C.
    k = jnp.dot(w_ref[1, 0], xk_ref[0],
                preferred_element_type=jnp.float32) + b_ref[1, 0]
    v = jnp.dot(w_ref[2, 0], xv_ref[0],
                preferred_element_type=jnp.float32) + b_ref[2, 0]

    # Scores^T: (tkv, tq) = K^T Q (Q already carries 1/sqrt(d)).
    st = lax.dot_general(k, q_ref[...], (((0,), (0,)), ((), ())),
                         preferred_element_type=jnp.float32)

    # Online softmax along the KV (sublane) axis; stats stay as (1, tq) rows and
    # broadcast over the (d, tq) accumulator without any relayout.
    m_prev = m_ref[...]
    m_new = jnp.maximum(m_prev, jnp.max(st, axis=0, keepdims=True))
    alpha = jnp.exp(m_prev - m_new)
    p = jnp.exp(st - m_new)                                        # (tkv, tq)
    l_ref[...] = alpha * l_ref[...] + jnp.sum(p, axis=0, keepdims=True)
    acc_ref[...] = alpha * acc_ref[...] + lax.dot_general(
        v, p, (((1,), (0,)), ((), ())), preferred_element_type=jnp.float32)
    m_ref[...] = m_new

    @pl.when(kv == pl.num_programs(3) - 1)
    def _():
        # Single lane-dense (d, tq) store, written exactly once per output block.
        o_ref[0] = (acc_ref[...] *
                    pl.reciprocal(l_ref[...], approx=False)).astype(o_ref.dtype)


# ---------------------------------------------------------------------------
# Wrapper
# ---------------------------------------------------------------------------
def multi_head_pixel_attention(query, key, value, params, num_heads, *,
                               tq=128, tkv=128):
    """query/key/value: (B, C, H, W) float32 NCHW (same as the PyTorch modules)."""
    B, C, H, W = query.shape
    S = H * W
    d = C // num_heads
    assert d * num_heads == C
    assert d % 8 == 0, "pad head_dim to a multiple of 8 (TPU sublane tile)"
    tq, tkv = min(tq, S), min(tkv, S)
    assert S % tq == 0 and S % tkv == 0

    # Channels-first (B, C, S) comes straight from NCHW with a free reshape:
    # no host-side transposes in either direction.
    xq = query.reshape(B, C, S)
    xk = key.reshape(B, C, S)
    xv = value.reshape(B, C, S)

    # Pack per-head projection weights/biases; fold 1/sqrt(d) into Wq/bq.
    scale = 1.0 / math.sqrt(d)
    wqkv = jnp.stack([params["wq"].reshape(num_heads, d, C) * scale,
                      params["wk"].reshape(num_heads, d, C),
                      params["wv"].reshape(num_heads, d, C)], axis=0)  # (3,nh,d,C)
    bqkv = jnp.stack([params["bq"].reshape(num_heads, d, 1) * scale,
                      params["bk"].reshape(num_heads, d, 1),
                      params["bv"].reshape(num_heads, d, 1)], axis=0)  # (3,nh,d,1)

    grid = (B, num_heads, S // tq, S // tkv)

    out_bcs = pl.pallas_call(
        _flash_mhpa_kernel,
        out_shape=jax.ShapeDtypeStruct((B, C, S), query.dtype),
        grid=grid,
        in_specs=[
            pl.BlockSpec((1, C, tq),   lambda b, h, i, j: (b, 0, i)),
            pl.BlockSpec((1, C, tkv),  lambda b, h, i, j: (b, 0, j)),
            pl.BlockSpec((1, C, tkv),  lambda b, h, i, j: (b, 0, j)),
            pl.BlockSpec((3, 1, d, C), lambda b, h, i, j: (0, h, 0, 0)),
            pl.BlockSpec((3, 1, d, 1), lambda b, h, i, j: (0, h, 0, 0)),
        ],
        out_specs=pl.BlockSpec((1, d, tq), lambda b, h, i, j: (b, h, i)),
        scratch_shapes=[
            pltpu.VMEM((d, tq), jnp.float32),   # projected Q
            pltpu.VMEM((1, tq), jnp.float32),   # running max
            pltpu.VMEM((1, tq), jnp.float32),   # running denominator
            pltpu.VMEM((d, tq), jnp.float32),   # running numerator
        ],
        compiler_params=pltpu.CompilerParams(
            dimension_semantics=("parallel", "parallel", "parallel", "arbitrary")),
    )(xq, xk, xv, wqkv, bqkv)

    return out_bcs.reshape(B, C, H, W)   # free flat reshape back to NCHW


# ---------------------------------------------------------------------------
# Deterministic parameter init (Conv2d(1x1) shapes; xavier_uniform weights)
# ---------------------------------------------------------------------------
def init_params(key, num_features):
    C = num_features
    ks = jax.random.split(key, 6)
    bound_w = math.sqrt(6.0 / (C + C))       # xavier_uniform for (C, C, 1, 1)
    bound_b = 1.0 / math.sqrt(C)             # PyTorch Conv2d default bias init

    def w(k):
        return jax.random.uniform(k, (C, C), jnp.float32, -bound_w, bound_w)

    def b(k):
        return jax.random.uniform(k, (C,), jnp.float32, -bound_b, bound_b)

    return {"wq": w(ks[0]), "bq": b(ks[1]),
            "wk": w(ks[2]), "bk": b(ks[3]),
            "wv": w(ks[4]), "bv": b(ks[5])}


# ---------------------------------------------------------------------------
# Pure-JAX reference for validation
# ---------------------------------------------------------------------------
def reference(query, key, value, params, num_heads):
    B, C, H, W = query.shape
    S = H * W
    d = C // num_heads

    def proj(x, w, b):
        return jnp.einsum("oc,bcs->bos", w, x.reshape(B, C, S),
                          precision="highest") + b[None, :, None]

    q = proj(query, params["wq"], params["bq"]).reshape(B, num_heads, d, S)
    k = proj(key,   params["wk"], params["bk"]).reshape(B, num_heads, d, S)
    v = proj(value, params["wv"], params["bv"]).reshape(B, num_heads, d, S)

    scores = jnp.einsum("bhds,bhdt->bhst", q, k,
                        precision="highest") / math.sqrt(d)
    attn = jax.nn.softmax(scores, axis=-1)
    out = jnp.einsum("bhst,bhdt->bhds", attn, v,
                     precision="highest")                 # (B, nh, d, S)
    return out.reshape(B, C, H, W)


# ---------------------------------------------------------------------------
if __name__ == "__main__":
    B, C, H, W = 2, 64, 16, 16
    num_heads = 8     # MultiHeadPixelAttention(num_heads=8) in the module

    root = jax.random.PRNGKey(0)
    kfa, kfb, kpa, kpb, kpx = jax.random.split(root, 5)
    # Stand-ins for the per-satellite backbone outputs (backbones not translated).
    feat_a = jax.random.normal(kfa, (B, C, H, W), jnp.float32)
    feat_b = jax.random.normal(kfb, (B, C, H, W), jnp.float32)

    params_a = init_params(kpa, C)   # attention_modules[sat_a]
    params_b = init_params(kpb, C)   # attention_modules[sat_b]
    params_x = init_params(kpx, C)   # cross_attention

    def forward(fa, fb):
        # per-satellite pixel self-attention
        ya = multi_head_pixel_attention(fa, fa, fa, params_a, num_heads)
        yb = multi_head_pixel_attention(fb, fb, fb, params_b, num_heads)
        # cross-attention fusion + residual (CombinedFusionModel fusion loop)
        fused = ya + multi_head_pixel_attention(ya, yb, yb, params_x, num_heads)
        # TODO(synk): conv_final (3x3 Conv2d) not translated.
        return fused

    out = jax.block_until_ready(forward(feat_a, feat_b))

    def ref_forward(fa, fb):
        ya = reference(fa, fa, fa, params_a, num_heads)
        yb = reference(fb, fb, fb, params_b, num_heads)
        return ya + reference(ya, yb, yb, params_x, num_heads)

    ref = jax.block_until_ready(ref_forward(feat_a, feat_b))
    assert out.shape == (B, C, H, W)
    err = jnp.max(jnp.abs(out - ref))
    assert jnp.allclose(out, ref, rtol=1e-4, atol=1e-4), f"mismatch: {err:.3e}"

    print("KERNEL_OK")
</pallas_src>

<mosaic_0001>
module attributes {stable_mosaic.version = 11 : i64} {
  func.func @_flash_mhpa_kernel(%arg0: i32, %arg1: i32, %arg2: i32, %arg3: i32, %arg4: memref<1x64x128xf32, #tpu.memory_space<vmem>>, %arg5: memref<1x64x128xf32, #tpu.memory_space<vmem>>, %arg6: memref<1x64x128xf32, #tpu.memory_space<vmem>>, %arg7: memref<3x1x8x64xf32, #tpu.memory_space<vmem>>, %arg8: memref<3x1x8x1xf32, #tpu.memory_space<vmem>>, %arg9: memref<1x8x128xf32, #tpu.memory_space<vmem>>, %arg10: memref<8x128xf32, #tpu.memory_space<vmem>>, %arg11: memref<1x128xf32, #tpu.memory_space<vmem>>, %arg12: memref<1x128xf32, #tpu.memory_space<vmem>>, %arg13: memref<8x128xf32, #tpu.memory_space<vmem>>) attributes {dimension_semantics = [#tpu.dimension_semantics<parallel>, #tpu.dimension_semantics<parallel>, #tpu.dimension_semantics<parallel>, #tpu.dimension_semantics<arbitrary>], iteration_bounds = array<i64: 2, 8, 2, 2>, scalar_prefetch = 0 : i64, scratch_operands = 4 : i64, tpu.core_type = #tpu.core_type<tc>, window_params = [{transform_indices = @transform_0, window_bounds = array<i64: 1, 64, 128>}, {transform_indices = @transform_1, window_bounds = array<i64: 1, 64, 128>}, {transform_indices = @transform_2, window_bounds = array<i64: 1, 64, 128>}, {transform_indices = @transform_3, window_bounds = array<i64: 3, 1, 8, 64>}, {transform_indices = @transform_4, window_bounds = array<i64: 3, 1, 8, 1>}, {transform_indices = @transform_5, window_bounds = array<i64: 1, 8, 128>}]} {
    %c0_i32 = arith.constant 0 : i32
    %0 = arith.cmpi eq, %arg3, %c0_i32 : i32
    %1 = arith.extui %0 : i1 to i32
    %c0_i32_0 = arith.constant 0 : i32
    %2 = arith.cmpi ne, %1, %c0_i32_0 : i32
    scf.if %2 {
      %c0_40 = arith.constant 0 : index
      %c0_41 = arith.constant 0 : index
      %c0_42 = arith.constant 0 : index
      %c0_43 = arith.constant 0 : index
      %48 = vector.load %arg7[%c0_40, %c0_41, %c0_42, %c0_43] : memref<3x1x8x64xf32, #tpu.memory_space<vmem>>, vector<1x1x8x64xf32>
      %49 = vector.shape_cast %48 : vector<1x1x8x64xf32> to vector<8x64xf32>
      %c0_44 = arith.constant 0 : index
      %c0_45 = arith.constant 0 : index
      %c0_46 = arith.constant 0 : index
      %50 = vector.load %arg4[%c0_44, %c0_45, %c0_46] : memref<1x64x128xf32, #tpu.memory_space<vmem>>, vector<1x64x128xf32>
      %51 = vector.shape_cast %50 : vector<1x64x128xf32> to vector<64x128xf32>
      %cst_47 = arith.constant dense<0.000000e+00> : vector<8x128xf32>
      %52 = tpu.matmul %49, %51, %cst_47 {dimension_numbers = #tpu.dot_dimension_numbers<[1], [0], [0], [1], [0, 0, 1, 1], [], []>} : vector<8x64xf32>, vector<64x128xf32>, vector<8x128xf32> -> vector<8x128xf32>
      %c0_48 = arith.constant 0 : index
      %c0_49 = arith.constant 0 : index
      %c0_50 = arith.constant 0 : index
      %c0_51 = arith.constant 0 : index
      %53 = vector.load %arg8[%c0_48, %c0_49, %c0_50, %c0_51] : memref<3x1x8x1xf32, #tpu.memory_space<vmem>>, vector<1x1x8x1xf32>
      %54 = vector.shape_cast %53 : vector<1x1x8x1xf32> to vector<8x1xf32>
      %55 = vector.broadcast %54 : vector<8x1xf32> to vector<8x128xf32>
      %56 = arith.addf %52, %55 : vector<8x128xf32>
      %c0_52 = arith.constant 0 : index
      %c0_53 = arith.constant 0 : index
      %57 = vector.load %arg10[%c0_52, %c0_53] : memref<8x128xf32, #tpu.memory_space<vmem>>, vector<8x128xf32>
      tpu.vector_store %arg10[%c0_52, %c0_53], %56 {strides = array<i32>} : memref<8x128xf32, #tpu.memory_space<vmem>>, vector<8x128xf32>,
      %cst_54 = arith.constant 0xFF800000 : f32
      %58 = vector.broadcast %cst_54 : f32 to vector<1x128xf32>
      %c0_55 = arith.constant 0 : index
      %c0_56 = arith.constant 0 : index
      %59 = vector.load %arg11[%c0_55, %c0_56] : memref<1x128xf32, #tpu.memory_space<vmem>>, vector<1x128xf32>
      tpu.vector_store %arg11[%c0_55, %c0_56], %58 {strides = array<i32>} : memref<1x128xf32, #tpu.memory_space<vmem>>, vector<1x128xf32>,
      %cst_57 = arith.constant 0.000000e+00 : f32
      %60 = vector.broadcast %cst_57 : f32 to vector<1x128xf32>
      %c0_58 = arith.constant 0 : index
      %c0_59 = arith.constant 0 : index
      %61 = vector.load %arg12[%c0_58, %c0_59] : memref<1x128xf32, #tpu.memory_space<vmem>>, vector<1x128xf32>
      tpu.vector_store %arg12[%c0_58, %c0_59], %60 {strides = array<i32>} : memref<1x128xf32, #tpu.memory_space<vmem>>, vector<1x128xf32>,
      %cst_60 = arith.constant 0.000000e+00 : f32
      %62 = vector.broadcast %cst_60 : f32 to vector<8x128xf32>
      %c0_61 = arith.constant 0 : index
      %c0_62 = arith.constant 0 : index
      %63 = vector.load %arg13[%c0_61, %c0_62] : memref<8x128xf32, #tpu.memory_space<vmem>>, vector<8x128xf32>
      tpu.vector_store %arg13[%c0_61, %c0_62], %62 {strides = array<i32>} : memref<8x128xf32, #tpu.memory_space<vmem>>, vector<8x128xf32>,
    } else {
    }
    %c1 = arith.constant 1 : index
    %c0 = arith.constant 0 : index
    %c0_1 = arith.constant 0 : index
    %c0_2 = arith.constant 0 : index
    %3 = vector.load %arg7[%c1, %c0, %c0_1, %c0_2] : memref<3x1x8x64xf32, #tpu.memory_space<vmem>>, vector<1x1x8x64xf32>
    %4 = vector.shape_cast %3 : vector<1x1x8x64xf32> to vector<8x64xf32>
    %c0_3 = arith.constant 0 : index
    %c0_4 = arith.constant 0 : index
    %c0_5 = arith.constant 0 : index
    %5 = vector.load %arg5[%c0_3, %c0_4, %c0_5] : memref<1x64x128xf32, #tpu.memory_space<vmem>>, vector<1x64x128xf32>
    %6 = vector.shape_cast %5 : vector<1x64x128xf32> to vector<64x128xf32>
    %cst = arith.constant dense<0.000000e+00> : vector<8x128xf32>
    %7 = tpu.matmul %4, %6, %cst {dimension_numbers = #tpu.dot_dimension_numbers<[1], [0], [0], [1], [0, 0, 1, 1], [], []>} : vector<8x64xf32>, vector<64x128xf32>, vector<8x128xf32> -> vector<8x128xf32>
    %c1_6 = arith.constant 1 : index
    %c0_7 = arith.constant 0 : index
    %c0_8 = arith.constant 0 : index
    %c0_9 = arith.constant 0 : index
    %8 = vector.load %arg8[%c1_6, %c0_7, %c0_8, %c0_9] : memref<3x1x8x1xf32, #tpu.memory_space<vmem>>, vector<1x1x8x1xf32>
    %9 = vector.shape_cast %8 : vector<1x1x8x1xf32> to vector<8x1xf32>
    %10 = vector.broadcast %9 : vector<8x1xf32> to vector<8x128xf32>
    %11 = arith.addf %7, %10 : vector<8x128xf32>
    %c2 = arith.constant 2 : index
    %c0_10 = arith.constant 0 : index
    %c0_11 = arith.constant 0 : index
    %c0_12 = arith.constant 0 : index
    %12 = vector.load %arg7[%c2, %c0_10, %c0_11, %c0_12] : memref<3x1x8x64xf32, #tpu.memory_space<vmem>>, vector<1x1x8x64xf32>
    %13 = vector.shape_cast %12 : vector<1x1x8x64xf32> to vector<8x64xf32>
    %c0_13 = arith.constant 0 : index
    %c0_14 = arith.constant 0 : index
    %c0_15 = arith.constant 0 : index
    %14 = vector.load %arg6[%c0_13, %c0_14, %c0_15] : memref<1x64x128xf32, #tpu.memory_space<vmem>>, vector<1x64x128xf32>
    %15 = vector.shape_cast %14 : vector<1x64x128xf32> to vector<64x128xf32>
    %cst_16 = arith.constant dense<0.000000e+00> : vector<8x128xf32>
    %16 = tpu.matmul %13, %15, %cst_16 {dimension_numbers = #tpu.dot_dimension_numbers<[1], [0], [0], [1], [0, 0, 1, 1], [], []>} : vector<8x64xf32>, vector<64x128xf32>, vector<8x128xf32> -> vector<8x128xf32>
    %c2_17 = arith.constant 2 : index
    %c0_18 = arith.constant 0 : index
    %c0_19 = arith.constant 0 : index
    %c0_20 = arith.constant 0 : index
    %17 = vector.load %arg8[%c2_17, %c0_18, %c0_19, %c0_20] : memref<3x1x8x1xf32, #tpu.memory_space<vmem>>, vector<1x1x8x1xf32>
    %18 = vector.shape_cast %17 : vector<1x1x8x1xf32> to vector<8x1xf32>
    %19 = vector.broadcast %18 : vector<8x1xf32> to vector<8x128xf32>
    %20 = arith.addf %16, %19 : vector<8x128xf32>
    %c0_21 = arith.constant 0 : index
    %c0_22 = arith.constant 0 : index
    %21 = vector.load %arg10[%c0_21, %c0_22] : memref<8x128xf32, #tpu.memory_space<vmem>>, vector<8x128xf32>
    %cst_23 = arith.constant dense<0.000000e+00> : vector<128x128xf32>
    %22 = tpu.matmul %11, %21, %cst_23 {dimension_numbers = #tpu.dot_dimension_numbers<[0], [0], [1], [1], [0, 1, 1, 1], [], []>} : vector<8x128xf32>, vector<8x128xf32>, vector<128x128xf32> -> vector<128x128xf32>
    %c0_24 = arith.constant 0 : index
    %c0_25 = arith.constant 0 : index
    %23 = vector.load %arg11[%c0_24, %c0_25] : memref<1x128xf32, #tpu.memory_space<vmem>>, vector<1x128xf32>
    %cst_26 = arith.constant dense<0xFF800000> : vector<128xf32>
    %24 = vector.multi_reduction <maximumf>, %22, %cst_26 [0] : vector<128x128xf32> to vector<128xf32>
    %25 = vector.shape_cast %24 : vector<128xf32> to vector<1x128xf32>
    %26 = arith.maximumf %23, %25 : vector<1x128xf32>
    %27 = arith.subf %23, %26 : vector<1x128xf32>
    %28 = math.exp %27 : vector<1x128xf32>
    %29 = vector.broadcast %26 : vector<1x128xf32> to vector<128x128xf32>
    %30 = arith.subf %22, %29 : vector<128x128xf32>
    %31 = math.exp %30 : vector<128x128xf32>
    %c0_27 = arith.constant 0 : index
    %c0_28 = arith.constant 0 : index
    %32 = vector.load %arg12[%c0_27, %c0_28] : memref<1x128xf32, #tpu.memory_space<vmem>>, vector<1x128xf32>
    %33 = arith.mulf %28, %32 : vector<1x128xf32>
    %cst_29 = arith.constant dense<0.000000e+00> : vector<128xf32>
    %34 = vector.multi_reduction <add>, %31, %cst_29 [0] : vector<128x128xf32> to vector<128xf32>
    %35 = vector.shape_cast %34 : vector<128xf32> to vector<1x128xf32>
    %36 = arith.addf %33, %35 : vector<1x128xf32>
    %c0_30 = arith.constant 0 : index
    %c0_31 = arith.constant 0 : index
    %37 = vector.load %arg12[%c0_30, %c0_31] : memref<1x128xf32, #tpu.memory_space<vmem>>, vector<1x128xf32>
    tpu.vector_store %arg12[%c0_30, %c0_31], %36 {strides = array<i32>} : memref<1x128xf32, #tpu.memory_space<vmem>>, vector<1x128xf32>,
    %c0_32 = arith.constant 0 : index
    %c0_33 = arith.constant 0 : index
    %38 = vector.load %arg13[%c0_32, %c0_33] : memref<8x128xf32, #tpu.memory_space<vmem>>, vector<8x128xf32>
    %39 = vector.broadcast %28 : vector<1x128xf32> to vector<8x128xf32>
    %40 = arith.mulf %39, %38 : vector<8x128xf32>
    %cst_34 = arith.constant dense<0.000000e+00> : vector<8x128xf32>
    %41 = tpu.matmul %20, %31, %cst_34 {dimension_numbers = #tpu.dot_dimension_numbers<[1], [0], [0], [1], [0, 0, 1, 1], [], []>} : vector<8x128xf32>, vector<128x128xf32>, vector<8x128xf32> -> vector<8x128xf32>
    %42 = arith.addf %40, %41 : vector<8x128xf32>
    %c0_35 = arith.constant 0 : index
    %c0_36 = arith.constant 0 : index
    %43 = vector.load %arg13[%c0_35, %c0_36] : memref<8x128xf32, #tpu.memory_space<vmem>>, vector<8x128xf32>
    tpu.vector_store %arg13[%c0_35, %c0_36], %42 {strides = array<i32>} : memref<8x128xf32, #tpu.memory_space<vmem>>, vector<8x128xf32>,
    %c0_37 = arith.constant 0 : index
    %c0_38 = arith.constant 0 : index
    %44 = vector.load %arg11[%c0_37, %c0_38] : memref<1x128xf32, #tpu.memory_space<vmem>>, vector<1x128xf32>
    tpu.vector_store %arg11[%c0_37, %c0_38], %26 {strides = array<i32>} : memref<1x128xf32, #tpu.memory_space<vmem>>, vector<1x128xf32>,
    %c1_i32 = arith.constant 1 : i32
    %45 = arith.cmpi eq, %arg3, %c1_i32 : i32
    %46 = arith.extui %45 : i1 to i32
    %c0_i32_39 = arith.constant 0 : i32
    %47 = arith.cmpi ne, %46, %c0_i32_39 : i32
    scf.if %47 {
      %c0_40 = arith.constant 0 : index
      %c0_41 = arith.constant 0 : index
      %48 = vector.load %arg13[%c0_40, %c0_41] : memref<8x128xf32, #tpu.memory_space<vmem>>, vector<8x128xf32>
      %c0_42 = arith.constant 0 : index
      %c0_43 = arith.constant 0 : index
      %49 = vector.load %arg12[%c0_42, %c0_43] : memref<1x128xf32, #tpu.memory_space<vmem>>, vector<1x128xf32>
      %50 = tpu.reciprocal %49 : vector<1x128xf32> -> vector<1x128xf32>
      %51 = vector.broadcast %50 : vector<1x128xf32> to vector<8x128xf32>
      %52 = arith.mulf %48, %51 : vector<8x128xf32>
      %c0_44 = arith.constant 0 : index
      %c0_45 = arith.constant 0 : index
      %c0_46 = arith.constant 0 : index
      %53 = vector.load %arg9[%c0_44, %c0_45, %c0_46] : memref<1x8x128xf32, #tpu.memory_space<vmem>>, vector<1x8x128xf32>
      %54 = vector.shape_cast %53 : vector<1x8x128xf32> to vector<8x128xf32>
      %55 = vector.shape_cast %52 : vector<8x128xf32> to vector<1x8x128xf32>
      tpu.vector_store %arg9[%c0_44, %c0_45, %c0_46], %55 {strides = array<i32>} : memref<1x8x128xf32, #tpu.memory_space<vmem>>, vector<1x8x128xf32>,
    } else {
    }
    return
  }
  func.func @transform_0(%arg0: i32, %arg1: i32, %arg2: i32, %arg3: i32) -> (i32, i32, i32) {
    %c0_i32 = arith.constant 0 : i32
    %c0_i32_0 = arith.constant 0 : i32
    return %arg0, %c0_i32, %arg2 : i32, i32, i32
  }
  func.func @transform_1(%arg0: i32, %arg1: i32, %arg2: i32, %arg3: i32) -> (i32, i32, i32) {
    %c0_i32 = arith.constant 0 : i32
    %c0_i32_0 = arith.constant 0 : i32
    return %arg0, %c0_i32, %arg3 : i32, i32, i32
  }
  func.func @transform_2(%arg0: i32, %arg1: i32, %arg2: i32, %arg3: i32) -> (i32, i32, i32) {
    %c0_i32 = arith.constant 0 : i32
    %c0_i32_0 = arith.constant 0 : i32
    return %arg0, %c0_i32, %arg3 : i32, i32, i32
  }
  func.func @transform_3(%arg0: i32, %arg1: i32, %arg2: i32, %arg3: i32) -> (i32, i32, i32, i32) {
    %c0_i32 = arith.constant 0 : i32
    %c0_i32_0 = arith.constant 0 : i32
    %c0_i32_1 = arith.constant 0 : i32
    %c0_i32_2 = arith.constant 0 : i32
    return %c0_i32, %arg1, %c0_i32_0, %c0_i32_1 : i32, i32, i32, i32
  }
  func.func @transform_4(%arg0: i32, %arg1: i32, %arg2: i32, %arg3: i32) -> (i32, i32, i32, i32) {
    %c0_i32 = arith.constant 0 : i32
    %c0_i32_0 = arith.constant 0 : i32
    %c0_i32_1 = arith.constant 0 : i32
    %c0_i32_2 = arith.constant 0 : i32
    return %c0_i32, %arg1, %c0_i32_0, %c0_i32_1 : i32, i32, i32, i32
  }
  func.func @transform_5(%arg0: i32, %arg1: i32, %arg2: i32, %arg3: i32) -> (i32, i32, i32) {
    %c0_i32 = arith.constant 0 : i32
    return %arg0, %arg1, %arg2 : i32, i32, i32
  }
}

</mosaic_0001>

<bundles_post_ra>
// kernel: tpu_custom_call.1
= control target key start
LH: loop header
LB: loop body
LE: loop exit
PB: predicated region body
PF: predicated region fallthrough
CT: control target
= control target key end

     0   :  { %s2707_s0 = inlined_call_operand.hbm [shape: f32[2,64,256], index: 0, kind: input, shape index: {}]   ;;  %s2708_s1 = inlined_call_operand.hbm [shape: f32[2,64,256], index: 1, kind: input, shape index: {}]   ;;  %s2709_s2 = inlined_call_operand.hbm [shape: f32[2,64,256], index: 2, kind: input, shape index: {}]   ;;  %s2710_s3 = inlined_call_operand.vmem [shape: f32[3,8,8,64], index: 3, kind: input, shape index: {}]   ;;  %s2711_s4 = inlined_call_operand.vmem [shape: f32[3,8,8,1], index: 4, kind: input, shape index: {}]   ;;  %s2712_s5 = inlined_call_operand.hbm [shape: f32[2,64,256], index: 5, kind: output, shape index: {}]  }
   0x1   :  { %2738 = sst [smem:[#allocation44_spill]] %s2707_s0 }
   0x2   :  { %2739 = sst [smem:[#allocation45_spill]] %s2708_s1 }
   0x3   :  { %2740 = sst [smem:[#allocation46_spill]] %s2710_s3 }
   0x4   :  { %2741 = sst [smem:[#allocation47_spill]] %s2711_s4 }
   0x5   :  { %2742 = sst [smem:[#allocation48_spill]] %s2712_s5 }
   0x6   :  { %10 = vsyncpa [#allocation7], 0 }
   0x7   :  { %12 = vsyncpa [#allocation7 + $0x1], 0 }
   0x8   :  { %13 = vsyncpa [#allocation10], 0 }
   0x9   :  { %15 = vsyncpa [#allocation10 + $0x1], 0 }
   0xa   :  { %16 = vsyncpa [#allocation8], 0 }
   0xb   :  { %18 = vsyncpa [#allocation8 + $0x1], 0  ;;  %s2166_s18 = smov 0   ;;  %s2168_s19 = smov 0  }
   0xc   :  { %s2170_s20 = smov 0   ;;  %s2172_s21 = smov 0  }
   0xd   :  { %s2174_s22 = smov 0   ;;  %s2176_s23 = smov 0  }
   0xe   :  { %s2178_s24 = smov 0   ;;  %s2180_s25 = smov 0  }
   0xf   :  { %s2182_s26 = smov 0   ;;  %s2184_s27 = smov 0  }
  0x10   :  { %s2186_s28 = smov 0   ;;  %s2188_s29 = smov 0  }
  0x11   :  { %s2190_s30 = smov 0   ;;  %s2192_s6 = smov 0  }
  0x12   :  { %s2194_s7 = smov 0   ;;  %s2196_s8 = smov 0  }
  0x13   :  { %s2198_s9 = smov 0   ;;  %s2200_s10 = smov 0  }
  0x14   :  { %s2202_s11 = smov 0   ;;  %s2204_s12 = smov 0  }
  0x15 LB: > { %2743 = sst [smem:[#allocation18_spill]] %s2044_s18  ;;  %s2267_s13 = sadd.s32 4294967295, %s2120_s12   ;;  %s2120_s12 = sphi %s2204_s12, %s24_s12   ;;  %s2116_s11 = sphi %s2202_s11, %s2827_s11   ;;  %s2112_s10 = sphi %s2200_s10, %s2818_s10   ;;  %s2108_s9 = sphi %s2198_s9, %s2826_s9   ;;  %s2104_s8 = sphi %s2196_s8, %s2816_s8   ;;  %s2100_s7 = sphi %s2194_s7, %s2825_s7   ;;  %s2096_s6 = sphi %s2192_s6, %s2815_s6   ;;  %s2092_s30 = sphi %s2190_s30, %s2824_s30   ;;  %s2088_s29 = sphi %s2188_s29, %s2814_s29   ;;  %s2084_s28 = sphi %s2186_s28, %s2823_s28   ;;  %s2080_s27 = sphi %s2184_s27, %s2822_s27   ;;  %s2076_s26 = sphi %s2182_s26, %s2812_s26   ;;  %s2072_s25 = sphi %s2180_s25, %s2811_s25   ;;  %s2068_s24 = sphi %s2178_s24, %s2810_s24   ;;  %s2064_s23 = sphi %s2176_s23, %s2809_s23   ;;  %s2060_s22 = sphi %s2174_s22, %s2821_s22   ;;  %s2056_s21 = sphi %s2172_s21, %s2820_s21   ;;  %s2052_s20 = sphi %s2170_s20, %s2807_s20   ;;  %s2048_s19 = sphi %s2168_s19, %s2806_s19   ;;  %s2044_s18 = sphi %s2166_s18, %s2805_s18  }
  0x16   : > { %2744 = sst [smem:[#allocation19_spill]] %s2048_s19  ;;  %s39_s15 = sadd.s32 1, %s2104_s8 }
  0x17   : > { %2745 = sst [smem:[#allocation20_spill]] %s2052_s20  ;;  %s42_s16 = sadd.s32 1, %s2108_s9 }
  0x18   : > { %2746 = sst [smem:[#allocation21_spill]] %s2056_s21  ;;  %p40_p0 = scmp.ge.s32.totalorder %s39_s15, 2 }
  0x19   : > { %2747 = sst [smem:[#allocation22_spill]] %s2068_s24  ;;  %s46_s17 = sadd.s32 1, %s2112_s10 }
  0x1a   : > { %2748 = sst [smem:[#allocation23_spill]] %s2072_s25  ;;  %s50_s5 = sadd.s32 1, %s2116_s11 }
  0x1b   : > { %2749 = sst [smem:[#allocation24_spill]] %s2080_s27  ;;  %s2829_s15 = smov (%p40_p0, %s39_s15), 0 }
  0x1c   : > { %2750 = sst [smem:[#allocation25_spill]] %s2088_s29  ;;  %s2831_s16 = smov (!%p40_p0, %s42_s16), %s2108_s9 }
  0x1d   : > { %2751 = sst [smem:[#allocation26_spill]] %s2092_s30  ;;  %p66_p1 = scmp.ne.s32.totalorder %s2084_s28, %s2080_s27 }
  0x1e   : > { %2752 = sst [smem:[#allocation27_spill]] %s2096_s6  ;;  %p67_p2 = scmp.eq.s32.totalorder %s2120_s12, 0 }
  0x1f   : > { %2753 = sst [smem:[#allocation28_spill]] %s2100_s7  ;;  %p44_p3 = scmp.ge.s32.totalorder %s2831_s16, 2 }
  0x20   : > { %2754 = sst [smem:[#allocation29_spill]] %s2104_s8  ;;  %p72_p4 = scmp.ne.s32.totalorder %s2080_s27, %s2076_s26 }
  0x21   : > { %2755 = sst [smem:[#allocation30_spill]] %s2112_s10  ;;  %p2285_p5 = por %p67_p2, %p66_p1 }
  0x22   : > { %2756 = sst [smem:[#allocation31_spill]] %s2267_s13  ;;  %p73_p6 = scmp.eq.s32.totalorder %s2267_s13, 0 }
  0x23   : > { %2757 = sst [smem:[#allocation32_spill]] %s2829_s15  ;;  %s2833_s16 = smov (%p44_p3, %s2831_s16), 0 }
  0x24   : > { %2759 = sst [smem:[#allocation33_spill]] %s2833_s16  ;;  %s2835_s17 = smov (!%p44_p3, %s46_s17), %s2112_s10 }
  0x25   : > { %s55_s7 = ssub.s32 %s2108_s9, %s2833_s16  ;;  %p2297_p7 = por %p73_p6, %p72_p4 }
  0x26   : > { %p48_p8 = scmp.ge.s32.totalorder %s2835_s17, 8  ;;  %s83_s26 = ssub.s32 %s2104_s8, %s2829_s15 }
  0x27   : > { %s2760_s30 = scalar_select %p2297_p7, 1, 0 }
  0x28   : > { %s87_s6 = sadd.s32 1, %s2072_s25  ;;  %p94_p9 = scmp.ne.s32.totalorder %s2072_s25, %s2068_s24 }
  0x29   : > { %2761 = sst [smem:[#allocation34_spill]] %s2760_s30  ;;  %s2837_s17 = smov (%p48_p8, %s2835_s17), 0 }
  0x2a   : > { %2762 = sst [smem:[#allocation35_spill]] %s2837_s17  ;;  %s2839_s5 = smov (!%p48_p8, %s50_s5), %s2116_s11 }
  0x2b   : > { %p2311_p10 = por %p94_p9, %p67_p2  ;;  %p100_p11 = scmp.ne.s32.totalorder %s2068_s24, %s2064_s23 }
  0x2c   : > { %p52_p12 = scmp.ge.s32.totalorder %s2839_s5, 2  ;;  %s138_s29 = ssub.s32 %s2112_s10, %s2837_s17 }
  0x2d   : > { %p2321_p13 = por %p100_p11, %p73_p6  ;;  %p139_p0 = scmp.eq.s32.totalorder %s138_s29, 0 }
  0x2e   : > { %s2841_s5 = smov (%p52_p12, %s2839_s5), 0  ;;  %s141_s30 = sadd.s32 1, %s2060_s22 }
  0x2f   : > { %s2764_s15 = scalar_select %p2321_p13, 1, 0 }
  0x30   : > { %2766 = sst [smem:[#allocation37_spill]] %s2841_s5  ;;  %p148_p1 = scmp.ne.s32.totalorder %s2060_s22, %s2056_s21 }
  0x31   : > { %2765 = sst [smem:[#allocation36_spill]] %s2764_s15  ;;  %s54_s23 = ssub.s32 %s2116_s11, %s2841_s5 }
  0x32   : > { %s197_s24 = sadd.s32 1, %s2052_s20  ;;  %s56_s17 = sor.u32 %s55_s7, %s54_s23 }
  0x33   : > { %s84_s27 = sor.u32 %s83_s26, %s54_s23  ;;  %p57_p3 = scmp.eq.s32.totalorder %s56_s17, 0 }
  0x34   : > { %p85_p4 = scmp.eq.s32.totalorder %s84_s27, 0  ;;  %s2768_s4 = sadd.s32 1, %s2084_s28 }
  0x35   : > { %s2334_s15 = scalar_select %p139_p0, %s2060_s22, %s141_s30  }
  0x36   : > { %s2339_s3 = scalar_select %p57_p3, %s2084_s28, %s2768_s4  }
  0x37   : > { %2767 = sst [smem:[#allocation38_spill]] %s2334_s15  ;;  %p2346_p6 = por %p148_p1, %p67_p2 }
  0x38   : > { %2769 = sst [smem:[#allocation39_spill]] %s2339_s3  ;;  %s192_s5 = sor.u32 %s138_s29, %s54_s23 }
  0x39   : > { %s2342_s10 = scalar_select %p85_p4, %s2072_s25, %s87_s6  }
  0x3a   : > { %s194_s0 = sor.u32 %s192_s5, %s55_s7  ;;  %p207_p8 = scmp.ne.s32.totalorder %s2052_s20, %s2048_s19 }
  0x3b   : > { %2770 = sst [smem:[#allocation40_spill]] %s2342_s10  ;;  %p195_p9 = scmp.eq.s32.totalorder %s194_s0, 0 }
  0x3c   : > { %p208_p11 = scmp.eq.s32.totalorder %s2267_s13, 63  ;;  %p213_p12 = scmp.ne.s32.totalorder %s2048_s19, %s2044_s18 }
  0x3d   : > { %s2772_s17 = sadd.s32 4294967294, %s2120_s12   ;;  %p1394_p2 = scmp.ge.s32.totalorder %s2120_s12, 64 }
  0x3e   : > { %p214_p13 = scmp.eq.s32.totalorder %s2772_s17, 63  ;;  %p2360_p0 = por %p208_p11, %p207_p8 }
  0x3f   : > { %s2358_s27 = scalar_select %p195_p9, %s2052_s20, %s197_s24  }
  0x40   : > { %s2774_s4 = scalar_select %p2360_p0, 1, 0 }
  0x41   : > { %2773 = sst [smem:[#allocation41_spill]] %s2358_s27  ;;  %p2364_p3 = por %p214_p13, %p213_p12 }
  0x42   : > { %2775 = sst [smem:[#allocation42_spill]] %s2774_s4  ;;  %230 = sbr.rel (%p1394_p2) target bundleno = 140 (0x8c), region = 16 }
  0x43   : > { %s2776_s30 = scalar_select %p2364_p3, 1, 0 }
  0x44   : > { %s2729_s0 = sshll.u32 (!%p1394_p2), %s2116_s11, 4  ;;  %s256_s5 = sand.u32 (!%p1394_p2), 1, %s2120_s12  }
  0x45   : > { %2777 = sst [smem:[#allocation43_spill]] %s2776_s30  ;;  %s258_s24 = sand.u32 (!%p1394_p2), 1, %s2072_s25  }
  0x46   : > { %s2372_s29 = sshll.u32 (!%p1394_p2), %s258_s24, 6  ;;  %s265_s6 = sadd.s32 (!%p1394_p2), %s2104_s8, %s2729_s0 }
  0x47   : > { %s1400_s7 = sshll.u32 %s265_s6, 7  ;;  %s260_s26 = scalar_lea.vmem [#allocation9], %s2372_s29 }
  0x48   : > { %s268_s23 = sshll.u32 %s260_s26, 4  ;;  %s2778_s1 = sld [smem:[#allocation45_spill]]  ;;  %s269_s23 = int_to_ptr.vmem [resolvable:$true] %s268_s23 }
  0x49   : > { %s2381_s15 = scalar_lea.sflag [#allocation10], %s256_s5  ;;  %s1858_s27 = scalar_lea.vmem %s269_s23, 1024 }
  0x4a   : > { %p1859_p13 = scmp.ne.s32.totalorder %s269_s23, %s1858_s27  ;;  %s2122_s24 = smov [#allocation9]  }
  0x4b   : > { %s1862_s25 = sshll.u32 %s2122_s24, 4  ;;  %s1863_s25 = int_to_ptr.vmem [resolvable:$false] %s1862_s25 }
  0x4c   : > { %p1860_p1 = pnand %p1859_p13, %p2311_p10  ;;  %s1864_s20 = scalar_lea.vmem %s1863_s25, 2048 }
  0x4d   : > { %p1865_p8 = scmp.lt.s32.totalorder %s269_s23, %s1863_s25  ;;  %p1866_p9 = scmp.lt.s32.totalorder %s1864_s20, %s1858_s27 }
  0x4e   : > { %s267_s10 = scalar_lea.hbm %s2778_s1, %s1400_s7  ;;  %p1861_p4 = pneg %p1860_p1 }
  0x4f   : > { %p1867_p11 = por %p1866_p9, %p1865_p8 }
  0x51   : > { %p1868_p12 = pnand %p1867_p11, %p1861_p4 }
  0x53   : > { %1871 = shalt.err (!%p1868_p12)
}
  0x54   : > { %s2123_s6 = smov 256   ;;  %s2124_s3 = smov 128  }
  0x55   : > { %s2125_s5 = smov 8   ;;  %s2394_s20 = scalar_lea.hbm %s2709_s2, %s1400_s7 }
  0x56   : > { %1625 = dma.hbm_to_vmem [thread:$0]  (%p2311_p10), %s267_s10, 1024, %s269_s23, %s2381_s15, %s2123_s6, %s2124_s3, %s2125_s5  }
  0x57   : > { %s282_s27 = scalar_lea.vmem [#allocation11], %s2372_s29  ;;  %s234_s24 = sand.u32 1, %s2084_s28  }
  0x58   : > { %s290_s17 = sshll.u32 %s282_s27, 4  ;;  %s1395_s0 = sshll.u32 %s234_s24, 6  ;;  %s2398_s17 = int_to_ptr.vmem [resolvable:$true] %s290_s17 }
  0x59   : > { %s2779_s1 = sshll.u32 %s2116_s11, 4  ;;  %s2780_s19 = sld [smem:[#allocation44_spill]] }
  0x5a   : > { %s243_s8 = sadd.s32 %s2108_s9, %s2779_s1  ;;  %s238_s10 = scalar_lea.vmem [#allocation6], %s1395_s0 }
  0x5b   : > { %s1397_s30 = sshll.u32 %s243_s8, 7  ;;  %s246_s23 = sshll.u32 %s238_s10, 4  ;;  %s247_s23 = int_to_ptr.vmem [resolvable:$true] %s246_s23 }
  0x5c   : > { %s235_s26 = scalar_lea.sflag [#allocation7], %s234_s24  ;;  %s1884_s25 = scalar_lea.vmem %s247_s23, 1024 }
  0x5d   : > { %p1885_p2 = scmp.ne.s32.totalorder %s247_s23, %s1884_s25  ;;  %s2126_s29 = smov [#allocation6]  }
  0x5e   : > { %s1888_s7 = sshll.u32 %s2126_s29, 4  ;;  %s1889_s7 = int_to_ptr.vmem [resolvable:$false] %s1888_s7 }
  0x5f   : > { %s245_s13 = scalar_lea.hbm %s2780_s19, %s1397_s30  ;;  %p1886_p13 = pnand %p1885_p2, %p2285_p5 }
  0x60   : > { %s1890_s27 = scalar_lea.vmem %s1889_s7, 2048  ;;  %p1891_p4 = scmp.lt.s32.totalorder %s247_s23, %s1889_s7 }
  0x61   : > { %p1887_p1 = pneg %p1886_p13  ;;  %p1892_p8 = scmp.lt.s32.totalorder %s1890_s27, %s1884_s25 }
  0x63   : > { %p1893_p9 = por %p1892_p8, %p1891_p4 }
  0x65   : > { %p1894_p11 = pnand %p1893_p9, %p1887_p1 }
  0x67   : > { %1897 = shalt.err (!%p1894_p11)
}
  0x68   : > { %1624 = dma.hbm_to_vmem [thread:$0]  (%p2285_p5), %s245_s13, 1024, %s247_s23, %s235_s26, %s2123_s6, %s2124_s3, %s2125_s5  }
  0x69   : > { %s1910_s1 = scalar_lea.vmem %s2398_s17, 1024  ;;  %s2127_s18 = smov [#allocation11]  }
  0x6a   : > { %p1911_p12 = scmp.ne.s32.totalorder %s2398_s17, %s1910_s1  ;;  %s1914_s19 = sshll.u32 %s2127_s18, 4  ;;  %s1915_s19 = int_to_ptr.vmem [resolvable:$false] %s1914_s19 }
  0x6b   : > { %s1916_s8 = scalar_lea.vmem %s1915_s19, 2048  ;;  %p1917_p1 = scmp.lt.s32.totalorder %s2398_s17, %s1915_s19 }
  0x6c   : > { %p1912_p2 = pnand %p1911_p12, %p2311_p10  ;;  %p1918_p4 = scmp.lt.s32.totalorder %s1916_s8, %s1910_s1 }
  0x6e   : > { %p1913_p13 = pneg %p1912_p2  ;;  %p1919_p8 = por %p1918_p4, %p1917_p1 }
  0x70   : > { %p1920_p9 = pnand %p1919_p8, %p1913_p13 }
  0x72   : > { %1923 = shalt.err (!%p1920_p9)
}
  0x73   : > { %1626 = dma.hbm_to_vmem [thread:$0]  (%p2311_p10), %s2394_s20, 1024, %s2398_s17, %s2381_s15, %s2123_s6, %s2124_s3, %s2125_s5  }
  0x74   : > { %299 = sbr.rel (!%p2346_p6) target bundleno = 128 (0x80), region = 32  ;;  %s2781_s13 = sld [smem:[#allocation30_spill]] (%p2346_p6) }
  0x75   : > { %s301_s14 = sand.u32 (%p2346_p6), 1, %s2060_s22   ;;  %s2782_s10 = sld [smem:[#allocation46_spill]] (%p2346_p6) }
  0x76   : > { %s1621_s30 = smul.u32 (%p2346_p6), 24, %s301_s14 }
  0x78   : > { %s303_s16 = scalar_lea.vmem (%p2346_p6), [#allocation12], %s1621_s30 }
  0x7a   : > { %s1404_s4 = sshll.u32 %s2781_s13, 3 }
  0x7b   : > { %s305_s23 = scalar_lea.vmem %s2782_s10, %s1404_s4 }
  0x7c   : > { %v338_v0 = vld [vmem:[%s305_s23] sm:$0xff] }
  0x7d   : > { %v340_v1 = vld [vmem:[%s305_s23 + $0x40] sm:$0xff]  ;;  %339 = vst [vmem:[%s303_s16] sm:$0xff] %v338_v0 }
  0x7e   : > { %v342_v2 = vld [vmem:[%s305_s23 + $0x80] sm:$0xff]  ;;  %341 = vst [vmem:[%s303_s16 + $0x8] sm:$0xff] %v340_v1 }
  0x7f   : > { %343 = vst [vmem:[%s303_s16 + $0x10] sm:$0xff] %v342_v2 }
  0x80 PF: > { %349 = sbr.rel (!%p2346_p6) target bundleno = 140 (0x8c), region = 70  ;;  %s2783_s15 = sld [smem:[#allocation30_spill]] (%p2346_p6) }
  0x81   : > { %s351_s6 = sand.u32 (%p2346_p6), 1, %s2060_s22   ;;  %s2784_s26 = sld [smem:[#allocation47_spill]] (%p2346_p6) }
  0x82   : > { %s1622_s5 = smul.u32 (%p2346_p6), 24, %s351_s6 }
  0x84   : > { %s353_s29 = scalar_lea.vmem (%p2346_p6), [#allocation13], %s1622_s5 }
  0x86   : > { %s1405_s3 = sshll.u32 %s2783_s15, 3 }
  0x87   : > { %s355_s25 = scalar_lea.vmem %s2784_s26, %s1405_s3 }
  0x88   : > { %v388_v3 = vld [vmem:[%s355_s25] sm:$0xff] }
  0x89   : > { %v390_v4 = vld [vmem:[%s355_s25 + $0x40] sm:$0xff]  ;;  %389 = vst [vmem:[%s353_s29] sm:$0xff] %v388_v3 }
  0x8a   : > { %v392_v5 = vld [vmem:[%s355_s25 + $0x80] sm:$0xff]  ;;  %391 = vst [vmem:[%s353_s29 + $0x8] sm:$0xff] %v390_v4 }
  0x8b   : > { %393 = vst [vmem:[%s353_s29 + $0x10] sm:$0xff] %v392_v5 }
  0x8c PF: > { %p1406_p5 = scmp.ge.s32.totalorder %s2120_s12, 1  ;;  %p398_p10 = scmp.lt.s32.totalorder %s2120_s12, 65 }
  0x8e   : > { %p399_p6 = pnand %p1406_p5, %p398_p10 }
  0x8f   : > { %s2785_s21 = sld [smem:[#allocation24_spill]] (!%p399_p6) }
  0x90   : > { %402 = sbr.rel (%p399_p6) target bundleno = 1308 (0x51c), region = 108 }
  0x95   : > { %s404_s27 = sand.u32 1, %s2785_s21  }
  0x96   : > { %s1407_s1 = sshll.u32 %s404_s27, 6  ;;  %s405_s18 = scalar_lea.sflag [#allocation7], %s404_s27 }
  0x97   : > { %s2443_s19 = scalar_lea.vmem [#allocation6], %s1407_s1 }
  0x98   : > { %2031 = dma.done.wait (%p2297_p7), %s405_s18, 1024  }
  0x99   : > { %2033 = vsyncadd (%p2297_p7), %s405_s18, 4294966272  ;;  %s2787_s8 = sld [smem:[#allocation31_spill]] }
  0x9a   : > { %s2788_s13 = sld [smem:[#allocation22_spill]] }
  0x9b   : > { %s2789_s14 = sld [smem:[#allocation36_spill]] }
  0x9f   : > { %s413_s4 = sand.u32 1, %s2787_s8  }
  0xa0   : > { %s415_s30 = sand.u32 1, %s2788_s13   ;;  %s414_s24 = scalar_lea.sflag [#allocation10], %s413_s4 }
  0xa1   : > { %s1408_s0 = sshll.u32 %s415_s30, 6  ;;  %p2790_p11 = scmp.ne.s32.totalorder %s2789_s14, 0 }
  0xa2   : > { %s2451_s10 = scalar_lea.vmem [#allocation9], %s1408_s0 }
  0xa3   : > { %2035 = dma.done.wait (%p2790_p11), %s414_s24, 2048  }
  0xa4   : > { %2037 = vsyncadd (%p2790_p11), %s414_s24, 4294965248  ;;  %s2791_s23 = sld [smem:[#allocation21_spill]]  ;;  %s2463_s20 = scalar_lea.vmem [#allocation11], %s1408_s0 }
  0xa5   : > { %s2792_s16 = sld [smem:[#allocation19_spill]] }
  0xa6   : > { %s2793_s29 = sld [smem:[#allocation25_spill]] }
  0xaa   : > { %s432_s15 = sand.u32 1, %s2791_s23  }
  0xab   : > { %s1623_s6 = smul.u32 24, %s432_s15  ;;  %s482_s3 = sand.u32 1, %s2792_s16  }
  0xac   : > { %s2461_s5 = sshll.u32 %s482_s3, 3  ;;  %p1411_p7 = scmp.ne.s32.totalorder %s2793_s29, 0 }
  0xad   : > { %s2465_s17 = scalar_lea.vmem [#allocation12], %s1623_s6  ;;  %s2467_s26 = scalar_lea.vmem [#allocation13], %s1623_s6 }
  0xae   : > { %s484_s25 = scalar_lea.vmem [#allocation14], %s2461_s5  ;;  %488 = sbr.rel (%p1411_p7) target bundleno = 392 (0x188), region = 132 }
  0xb3   : > { %v497_v6 = vld [vmem:[%s2443_s19 + $0x38] sm:$0xff]  ;;  %v2128_v7 = vmov 0.0   ;;  %v496_v8 = vld [vmem:[%s2443_s19 + $0x30] sm:$0xff]  ;;  %vm2129_vm0 = vmmov 0   ;;  %v2130_v9 = vmov 0   ;;  %v495_v10 = vld [vmem:[%s2443_s19 + $0x28] sm:$0xff] }
  0xb4   : > { %1503 = vmatprep.subr.mxu0 %v2128_v7  ;;  %580 = vst [vmem:[#allocation4] sm:$0x1] %v2128_v7  ;;  %581 = vst [vmem:[#allocation5] sm:$0xff] %v2128_v7  ;;  %1519 = vmatprep.mubr.msk.f32.mxu0 %vm2129_vm0, %v2128_v7  ;;  %v498_v11 = vld [vmem:[%s2467_s26] sm:$0xff]  ;;  %v494_v12 = vld [vmem:[%s2443_s19 + $0x20] sm:$0xff]  ;;  %vm504_vm1 = vcmask 523264  }
  0xb5   : > { %1504 = vmatpush3.msra.mxu0 %v497_v6  ;;  %1807 = vset.pattern.permute.xlu0 %v2130_v9  ;;  %v493_v13 = vld [vmem:[%s2443_s19 + $0x18] sm:$0xff]  ;;  %v492_v14 = vld [vmem:[%s2443_s19 + $0x10] sm:$0xff]  ;;  %v491_v15 = vld [vmem:[%s2443_s19 + $0x8] sm:$0xff]  ;;  %v2131_v18 = vmov -inf  }
  0xb6   : > { %1505 = vmatprep.subr.mxu0 %v2128_v7  ;;  %501 = vperm.xlu0 %1807, %v498_v11   ;;  %v490_v16 = vld [vmem:[%s2443_s19] sm:$0xff]  ;;  %579 = vst [vmem:[#allocation3] sm:$0x1] %v2131_v18 }
  0xb7   : > { %1506 = vmatpush3.msra.mxu0 %v496_v8  ;;  %v489_v17 = vld [vmem:[%s2465_s17] sm:$0xff] }
  0xb8   : > { %1507 = vmatprep.subr.mxu0 %v2128_v7 }
  0xb9   : > { %1508 = vmatpush3.msra.mxu0 %v495_v10 }
  0xba   : > { %1509 = vmatprep.subr.mxu0 %v2128_v7 }
  0xbb   : > { %1510 = vmatpush3.msra.mxu0 %v494_v12 }
  0xbc   : > { %1511 = vmatprep.subr.mxu0 %v2128_v7 }
  0xbd   : > { %1512 = vmatpush3.msra.mxu0 %v493_v13 }
  0xbe   : > { %1513 = vmatprep.subr.mxu0 %v2128_v7 }
  0xbf   : > { %1514 = vmatpush3.msra.mxu0 %v492_v14 }
  0xc0   : > { %1515 = vmatprep.subr.mxu0 %v2128_v7 }
  0xc1   : > { %1516 = vmatpush3.msra.mxu0 %v491_v15 }
  0xc2   : > { %1517 = vmatprep.subr.mxu0 %v2128_v7 }
  0xc3   : > { %1518 = vmatpush3.msra.mxu0 %v490_v16 }
  0xc4   : > { %1520 = vmatmul.mubr.msk.f32.vlgmr.msra.gmra.mxu0 %vm504_vm1, %v489_v17 }
 0x131   : > { %v502_v19 = vpop.permute.xlu0 %501 }
 0x184   : > { %v574_v20 = vpop.f32.mrf.mxu0 }
 0x185   : > { %v575_v21 = vadd.f32 %v574_v20, %v502_v19 }
 0x186   : > { %v1521_v22 = vpop.f32.mrf.mxu0 }
 0x187   : > { %578 = vst [vmem:[#allocation2] sm:$0xff] %v575_v21 }
 0x188 PF: > { %v591_v23 = vld [vmem:[%s2451_s10 + $0x38] sm:$0xff]  ;;  %v2132_v24 = vmov 0.0   ;;  %v590_v25 = vld [vmem:[%s2451_s10 + $0x30] sm:$0xff]  ;;  %vm2133_vm2 = vmmov 0   ;;  %v2134_v26 = vmov 0   ;;  %v589_v27 = vld [vmem:[%s2451_s10 + $0x28] sm:$0xff] }
 0x189   : > { %1522 = vmatprep.subr.mxu0 %v2132_v24  ;;  %1538 = vmatprep.mubr.msk.f32.mxu0 %vm2133_vm2, %v2132_v24  ;;  %v1414_v28 = vld [vmem:[%s2467_s26 + $0x8] sm:$0xff]  ;;  %v588_v29 = vld [vmem:[%s2451_s10 + $0x20] sm:$0xff]  ;;  %v585_v32 = vld [vmem:[%s2451_s10 + $0x8] sm:$0xff]  ;;  %vm599_vm3 = vcmask 523264   ;;  %vm796_vm4 = vcmask 64512   ;;  %s2794_s21 = sld [smem:[#allocation25_spill]] }
 0x18a   : > { %1523 = vmatpush3.msra.mxu0 %v591_v23  ;;  %1808 = vset.pattern.permute.xlu0 %v2134_v26  ;;  %v587_v30 = vld [vmem:[%s2451_s10 + $0x18] sm:$0xff]  ;;  %v586_v31 = vld [vmem:[%s2451_s10 + $0x10] sm:$0xff]  ;;  %v584_v33 = vld [vmem:[%s2451_s10] sm:$0xff] }
 0x18b   : > { %1524 = vmatprep.subr.mxu0 %v2132_v24  ;;  %1541 = vmatprep.subr.mxu1 %v2132_v24  ;;  %v1413_v34 = vld [vmem:[%s2465_s17 + $0x8] sm:$0xff]  ;;  %v682_v40 = vld [vmem:[%s2463_s20 + $0x38] sm:$0xff]  ;;  %v681_v41 = vld [vmem:[%s2463_s20 + $0x30] sm:$0xff] }
 0x18c   : > { %1525 = vmatpush3.msra.mxu0 %v590_v25  ;;  %596 = vperm.xlu0 %1808, %v1414_v28   ;;  %v680_v42 = vld [vmem:[%s2463_s20 + $0x28] sm:$0xff]  ;;  %v679_v43 = vld [vmem:[%s2463_s20 + $0x20] sm:$0xff]  ;;  %v678_v44 = vld [vmem:[%s2463_s20 + $0x18] sm:$0xff] }
 0x18d   : > { %1526 = vmatprep.subr.mxu0 %v2132_v24  ;;  %1557 = vmatprep.mubr.msk.f32.mxu1 %vm2133_vm2, %v2132_v24  ;;  %v677_v45 = vld [vmem:[%s2463_s20 + $0x10] sm:$0xff]  ;;  %v676_v46 = vld [vmem:[%s2463_s20 + $0x8] sm:$0xff]  ;;  %v675_v47 = vld [vmem:[%s2463_s20] sm:$0xff] }
 0x18e   : > { %1527 = vmatpush3.msra.mxu0 %v589_v27  ;;  %1809 = vset.pattern.permute.xlu1 %v2134_v26  ;;  %v763_v37 = vld [vmem:[#allocation2] sm:$0xff]  ;;  %v1417_v1 = vld [vmem:[%s2467_s26 + $0x10] sm:$0xff] }
 0x18f   : > { %1528 = vmatprep.subr.mxu0 %v2132_v24  ;;  %1542 = vmatpush3.msra.mxu1 %v682_v40  ;;  %v1416_v48 = vld [vmem:[%s2465_s17 + $0x10] sm:$0xff]  ;;  %p1435_p12 = scmp.ne.s32.totalorder %s2794_s21, 1 }
 0x190   : > { %1529 = vmatpush3.msra.mxu0 %v588_v29  ;;  %1543 = vmatprep.subr.mxu1 %v2132_v24 }
 0x191   : > { %1530 = vmatprep.subr.mxu0 %v2132_v24  ;;  %1544 = vmatpush3.msra.mxu1 %v681_v41 }
 0x192   : > { %1531 = vmatpush3.msra.mxu0 %v587_v30  ;;  %1545 = vmatprep.subr.mxu1 %v2132_v24 }
 0x193   : > { %1532 = vmatprep.subr.mxu0 %v2132_v24  ;;  %1546 = vmatpush3.msra.mxu1 %v680_v42 }
 0x194   : > { %1533 = vmatpush3.msra.mxu0 %v586_v31  ;;  %1547 = vmatprep.subr.mxu1 %v2132_v24 }
 0x195   : > { %1534 = vmatprep.subr.mxu0 %v2132_v24  ;;  %1548 = vmatpush3.msra.mxu1 %v679_v43  ;;  %v990_v43 = vld [vmem:[#allocation3] sm:$0x1] }
 0x196   : > { %1535 = vmatpush3.msra.mxu0 %v585_v32  ;;  %1549 = vmatprep.subr.mxu1 %v2132_v24 }
 0x197   : > { %1536 = vmatprep.subr.mxu0 %v2132_v24  ;;  %1550 = vmatpush3.msra.mxu1 %v678_v44 }
 0x198   : > { %1537 = vmatpush3.msra.mxu0 %v584_v33  ;;  %1551 = vmatprep.subr.mxu1 %v2132_v24 }
 0x199   : > { %1539 = vmatmul.mubr.msk.f32.vlgmr.msra.gmra.mxu0 %vm599_vm3, %v1413_v34  ;;  %1560 = vmatprep.subr.mxu0 %v763_v37 }
 0x19a   : > { %1561 = vmatpush3.msra.mxu0 %v763_v37  ;;  %1552 = vmatpush3.msra.mxu1 %v677_v45 }
 0x19b   : > { %1553 = vmatprep.subr.mxu1 %v2132_v24  ;;  %687 = vperm.xlu1 %1809, %v1417_v1  }
 0x19c   : > { %1554 = vmatpush3.msra.mxu1 %v676_v46 }
 0x19d   : > { %1555 = vmatprep.subr.mxu1 %v2132_v24 }
 0x19e   : > { %1556 = vmatpush3.msra.mxu1 %v675_v47 }
 0x19f   : > { %1558 = vmatmul.mubr.msk.f32.vlgmr.msra.gmra.mxu1 %vm599_vm3, %v1416_v48  ;;  %1586 = vmatprep.subr.mxu1 %v2132_v24 }
 0x1a0   : > { %1618 = vmatprep.mubr.msk.f32.mxu1 %vm2133_vm2, %v2132_v24 }
 0x207   : > { %v597_v35 = vpop.permute.xlu0 %596 }
 0x259   : > { %v669_v36 = vpop.f32.mrf.mxu0 }
 0x25a   : > { %v670_v38 = vadd.f32 %v669_v36, %v597_v35 }
 0x25b   : > { %v1540_v39 = vpop.f32.mrf.mxu0 }
 0x25c   : > { %764 = vxpose.xlu0.b32.start.end [1/1] (short) %v670_v38, 128  ;;  %v1017_v38 = vlaneseq }
 0x25e   : > { %v1018_v41 = vshrl.u32 %v1017_v38, 7 }
 0x25f   : > { %v2542_v3 = vpop.f32.mrf.mxu1 }
 0x260   : > { %v2565_v45 = vsub.s32 0, %v1018_v41 }
 0x261   : > { %v1559_v4 = vpop.f32.mrf.mxu1 }
 0x2d8   : > { %v780_v49 = vpop.trf.xlu0 }
 0x2d9   : > { %1562 = vmatprep.mubr.msk.f32.mxu0 %vm796_vm4, %v780_v49 }
 0x2dc   : > { %v781_v50 = vpop.trf.xlu0 }
 0x2dd   : > { %1563 = vmatmul.mubr.msk.f32.vlgmr.msra.gmra.mxu0 %vm796_vm4, %v781_v50 }
 0x2e0   : > { %v782_v51 = vpop.trf.xlu0 }
 0x2e1   : > { %1565 = vmatprep.mubr.msk.f32.mxu0 %vm796_vm4, %v782_v51 }
 0x2e4   : > { %v783_v52 = vpop.trf.xlu0 }
 0x2e5   : > { %1566 = vmatmul.mubr.msk.f32.gmra.mxu0 %vm796_vm4, %v783_v52 }
 0x2e8   : > { %v784_v53 = vpop.trf.xlu0 }
 0x2e9   : > { %1568 = vmatprep.mubr.msk.f32.mxu0 %vm796_vm4, %v784_v53 }
 0x2ec   : > { %v785_v54 = vpop.trf.xlu0 }
 0x2ed   : > { %1569 = vmatmul.mubr.msk.f32.gmra.mxu0 %vm796_vm4, %v785_v54 }
 0x2f0   : > { %v786_v55 = vpop.trf.xlu0 }
 0x2f1   : > { %1571 = vmatprep.mubr.msk.f32.mxu0 %vm796_vm4, %v786_v55 }
 0x2f4   : > { %v787_v56 = vpop.trf.xlu0 }
 0x2f5   : > { %1572 = vmatmul.mubr.msk.f32.gmra.mxu0 %vm796_vm4, %v787_v56 }
 0x2f8   : > { %v788_v57 = vpop.trf.xlu0 }
 0x2f9   : > { %1574 = vmatprep.mubr.msk.f32.mxu0 %vm796_vm4, %v788_v57 }
 0x2fc   : > { %v789_v58 = vpop.trf.xlu0 }
 0x2fd   : > { %1575 = vmatmul.mubr.msk.f32.gmra.mxu0 %vm796_vm4, %v789_v58 }
 0x300   : > { %v790_v59 = vpop.trf.xlu0 }
 0x301   : > { %1577 = vmatprep.mubr.msk.f32.mxu0 %vm796_vm4, %v790_v59 }
 0x304   : > { %v791_v60 = vpop.trf.xlu0 }
 0x305   : > { %1578 = vmatmul.mubr.msk.f32.gmra.mxu0 %vm796_vm4, %v791_v60 }
 0x308   : > { %v792_v61 = vpop.trf.xlu0 }
 0x309   : > { %1580 = vmatprep.mubr.msk.f32.mxu0 %vm796_vm4, %v792_v61 }
 0x30c   : > { %v793_v62 = vpop.trf.xlu0 }
 0x30d   : > { %1581 = vmatmul.mubr.msk.f32.gmra.mxu0 %vm796_vm4, %v793_v62 }
 0x310   : > { %v794_v63 = vpop.trf.xlu0 }
 0x311   : > { %1583 = vmatprep.mubr.msk.f32.mxu0 %vm796_vm4, %v794_v63 }
 0x314   : > { %v795_v0 = vpop.trf.xlu0 }
 0x315   : > { %1584 = vmatmul.mubr.msk.f32.gmra.mxu0 %vm796_vm4, %v795_v0 }
 0x39d   : > { %v1564_v2 = vpop.f32.mrf.mxu0 }
 0x39f   : > { %v911_v5 = vpop.f32.mrf.mxu0 }
 0x3a5   : > { %v1567_v6 = vpop.f32.mrf.mxu0 }
 0x3a7   : > { %v921_v7 = vpop.f32.mrf.mxu0 }
 0x3ad   : > { %v1570_v8 = vpop.f32.mrf.mxu0 }
 0x3ae   : > { %v992_v19 = vmax.f32 %v1564_v2, %v1570_v8 }
 0x3af   : > { %v931_v9 = vpop.f32.mrf.mxu0 }
 0x3b0   : > { %v991_v17 = vmax.f32 %v911_v5, %v931_v9 }
 0x3b5   : > { %v2544_v10 = vpop.f32.mrf.mxu0 }
 0x3b6   : > { %v994_v20 = vmax.f32 %v1567_v6, %v2544_v10 }
 0x3b7   : > { %v941_v11 = vpop.f32.mrf.mxu0 }
 0x3b8   : > { %v993_v21 = vmax.f32 %v921_v7, %v941_v11 }
 0x3bd   : > { %v2546_v12 = vpop.f32.mrf.mxu0 }
 0x3be   : > { %v996_v25 = vmax.f32 %v992_v19, %v2546_v12 }
 0x3bf   : > { %v2548_v13 = vpop.f32.mrf.mxu0 }
 0x3c0   : > { %v995_v22 = vmax.f32 %v991_v17, %v2548_v13 }
 0x3c5   : > { %v2550_v14 = vpop.f32.mrf.mxu0 }
 0x3c6   : > { %v998_v26 = vmax.f32 %v994_v20, %v2550_v14 }
 0x3c7   : > { %v2552_v15 = vpop.f32.mrf.mxu0 }
 0x3c8   : > { %v997_v27 = vmax.f32 %v993_v21, %v2552_v15 }
 0x3cd   : > { %v2554_v16 = vpop.f32.mrf.mxu0 }
 0x3ce   : > { %v1000_v30 = vmax.f32 %v996_v25, %v2554_v16 }
 0x3cf   : > { %v2556_v18 = vpop.f32.mrf.mxu0 }
 0x3d0   : > { %v999_v28 = vmax.f32 %v995_v22, %v2556_v18 }
 0x3d2   : > { %v1003_v33 = vmax.f32 %v999_v28, %v1000_v30 }
 0x3d5   : > { %v1585_v23 = vpop.f32.mrf.mxu0 }
 0x3d6   : > { %v1002_v31 = vmax.f32 %v998_v26, %v1585_v23 }
 0x3d7   : > { %v981_v29 = vpop.f32.mrf.mxu0 }
 0x3d8   : > { %v1001_v32 = vmax.f32 %v997_v27, %v981_v29 }
 0x3da   : > { %v1004_v34 = vmax.f32 %v1001_v32, %v1002_v31 }
 0x3dc   : > { %v1005_v35 = vmax.f32 %v1003_v33, %v1004_v34 }
 0x3de   : > { %v1006_v36 = vrot.slane %v1005_v35, 4 }
 0x3e0   : > { %v1007_v37 = vmax.f32 %v1005_v35, %v1006_v36 }
 0x3e2   : > { %v1008_v39 = vrot.slane %v1007_v37, 2 }
 0x3e4   : > { %v1009_v40 = vmax.f32 %v1007_v37, %v1008_v39 }
 0x3e6   : > { %v1010_v42 = vrot.slane %v1009_v40, 1 }
 0x3e8   : > { %v1011_v44 = vmax.f32 %v1009_v40, %v1010_v42 }
 0x3ea   : > { %v1012_v46 = vmax.f32 %v990_v43, %v1011_v44 }
 0x3ec   : > { %v1013_v47 = vsub.f32 %v990_v43, %v1012_v46  ;;  %v1020_v48 = vrot.slane %v1012_v46, %v2565_v45  ;;  %1175 = vst [vmem:[#allocation3] sm:$0x1] %v1012_v46 }
 0x3ee   : > { %v1014_v49 = vmul.f32 1.442695, %v1013_v47  ;;  %v1022_v50 = vsub.f32 %v911_v5, %v1020_v48  ;;  %v1023_v51 = vsub.f32 %v1564_v2, %v1020_v48  ;;  %v1024_v52 = vsub.f32 %v921_v7, %v1020_v48 }
 0x3ef   : > { %v1025_v53 = vsub.f32 %v1567_v6, %v1020_v48  ;;  %v1026_v56 = vsub.f32 %v931_v9, %v1020_v48  ;;  %v1027_v58 = vsub.f32 %v1570_v8, %v1020_v48  ;;  %v1028_v60 = vsub.f32 %v941_v11, %v1020_v48 }
 0x3f0   : > { %1810 = vpow2.f32 %v1014_v49  ;;  %v1038_v54 = vmul.f32 1.442695, %v1022_v50  ;;  %v1040_v55 = vmul.f32 1.442695, %v1023_v51  ;;  %v1042_v57 = vmul.f32 1.442695, %v1024_v52 }
 0x3f1   : > { %v1044_v59 = vmul.f32 1.442695, %v1025_v53  ;;  %v1046_v61 = vmul.f32 1.442695, %v1026_v56  ;;  %v1029_v62 = vsub.f32 %v2544_v10, %v1020_v48  ;;  %v1048_v63 = vmul.f32 1.442695, %v1027_v58 }
 0x3f2   : > { %1812 = vpow2.f32 %v1038_v54  ;;  %v1030_v0 = vsub.f32 %v2548_v13, %v1020_v48  ;;  %v1037_v1 = vsub.f32 %v1585_v23, %v1020_v48  ;;  %v1050_v2 = vmul.f32 1.442695, %v1028_v60  ;;  %v1070_v58 = vld [vmem:[#allocation4] sm:$0x1]  ;;  %v688_v60 = vpop.permute.xlu1 %687 }
 0x3f3   : > { %1814 = vpow2.f32 %v1040_v55  ;;  %v1031_v4 = vsub.f32 %v2546_v12, %v1020_v48  ;;  %v1036_v6 = vsub.f32 %v981_v29, %v1020_v48  ;;  %v1052_v7 = vmul.f32 1.442695, %v1029_v62 }
 0x3f4   : > { %1816 = vpow2.f32 %v1042_v57  ;;  %v1032_v8 = vsub.f32 %v2552_v15, %v1020_v48  ;;  %v1054_v9 = vmul.f32 1.442695, %v1030_v0  ;;  %v1035_v11 = vsub.f32 %v2554_v16, %v1020_v48 }
 0x3f5   : > { %1818 = vpow2.f32 %v1044_v59  ;;  %v1068_v13 = vmul.f32 1.442695, %v1037_v1  ;;  %v1033_v17 = vsub.f32 %v2550_v14, %v1020_v48  ;;  %v1056_v19 = vmul.f32 1.442695, %v1031_v4  ;;  %v1095_v1 = vld [vmem:[#allocation5] sm:$0xff] }
 0x3f6   : > { %1820 = vpow2.f32 %v1046_v61  ;;  %v1034_v12 = vsub.f32 %v2556_v18, %v1020_v48  ;;  %v1066_v21 = vmul.f32 1.442695, %v1036_v6  ;;  %v1058_v15 = vmul.f32 1.442695, %v1032_v8 }
 0x3f7   : > { %1822 = vpow2.f32 %v1048_v63  ;;  %v1064_v23 = vmul.f32 1.442695, %v1035_v11  ;;  %v1060_v14 = vmul.f32 1.442695, %v1033_v17  ;;  %v760_v63 = vadd.f32 %v2542_v3, %v688_v60 }
 0x3f8   : > { %1824 = vpow2.f32 %v1050_v2  ;;  %v1062_v26 = vmul.f32 1.442695, %v1034_v12 }
 0x3f9   : > { %1826 = vpow2.f32 %v1052_v7 }
 0x3fa   : > { %1828 = vpow2.f32 %v1054_v9 }
 0x3fb   : > { %1830 = vpow2.f32 %v1068_v13 }
 0x3fc   : > { %1832 = vpow2.f32 %v1056_v19 }
 0x3fd   : > { %v2571_v5 = vpop.eup %1810  ;;  %1834 = vpow2.f32 %v1066_v21 }
 0x3fe   : > { %v1100_v10 = vrot.slane %v2571_v5, %v2565_v45  ;;  %1836 = vpow2.f32 %v1058_v15  ;;  %v1071_v61 = vmul.f32 %v2571_v5, %v1070_v58 }
 0x3ff   : > { %v2578_v20 = vpop.eup %1812  ;;  %1838 = vpow2.f32 %v1064_v23 }
 0x400   : > { %v2581_v22 = vpop.eup %1814  ;;  %1840 = vpow2.f32 %v1060_v14  ;;  %v1102_v2 = vmul.f32 %v1100_v10, %v1095_v1 }
 0x401   : > { %v1072_v16 = vadd.f32 %v2581_v22, %v2578_v20  ;;  %v2585_v25 = vpop.eup %1816  ;;  %1842 = vpow2.f32 %v1062_v26 }
 0x402   : > { %v1819_v18 = vpop.eup %1818 }
 0x403   : > { %v1073_v27 = vadd.f32 %v2585_v25, %v1072_v16  ;;  %v1821_v29 = vpop.eup %1820 }
 0x404   : > { %v1823_v31 = vpop.eup %1822 }
 0x405   : > { %v1074_v28 = vadd.f32 %v1819_v18, %v1073_v27  ;;  %v1825_v33 = vpop.eup %1824 }
 0x406   : > { %v1827_v35 = vpop.eup %1826 }
 0x407   : > { %v1075_v30 = vadd.f32 %v1821_v29, %v1074_v28  ;;  %v1829_v36 = vpop.eup %1828 }
 0x408   : > { %v1831_v38 = vpop.eup %1830 }
 0x409   : > { %v1076_v32 = vadd.f32 %v1823_v31, %v1075_v30  ;;  %v1833_v39 = vpop.eup %1832  ;;  %1587 = vmatpush3.msra.mxu1 %v1831_v38 }
 0x40a   : > { %v1835_v41 = vpop.eup %1834  ;;  %1588 = vmatprep.subr.mxu1 %v2132_v24 }
 0x40b   : > { %v1077_v34 = vadd.f32 %v1825_v33, %v1076_v32  ;;  %v1837_v42 = vpop.eup %1836  ;;  %1589 = vmatpush3.msra.mxu1 %v1835_v41 }
 0x40c   : > { %v1839_v44 = vpop.eup %1838  ;;  %1590 = vmatprep.subr.mxu1 %v2132_v24 }
 0x40d   : > { %v1078_v37 = vadd.f32 %v1827_v35, %v1077_v34  ;;  %v1841_v46 = vpop.eup %1840  ;;  %1591 = vmatpush3.msra.mxu1 %v1839_v44 }
 0x40e   : > { %v1843_v48 = vpop.eup %1842  ;;  %1592 = vmatprep.subr.mxu1 %v2132_v24 }
 0x40f   : > { %v1079_v40 = vadd.f32 %v1829_v36, %v1078_v37  ;;  %1593 = vmatpush3.msra.mxu1 %v1843_v48 }
 0x410   : > { %1594 = vmatprep.subr.mxu1 %v2132_v24 }
 0x411   : > { %v1080_v43 = vadd.f32 %v1833_v39, %v1079_v40  ;;  %1595 = vmatpush3.msra.mxu1 %v1841_v46 }
 0x412   : > { %1596 = vmatprep.subr.mxu1 %v2132_v24 }
 0x413   : > { %v1081_v47 = vadd.f32 %v1837_v42, %v1080_v43  ;;  %1597 = vmatpush3.msra.mxu1 %v1837_v42 }
 0x414   : > { %1598 = vmatprep.subr.mxu1 %v2132_v24 }
 0x415   : > { %v1082_v49 = vadd.f32 %v1841_v46, %v1081_v47  ;;  %1599 = vmatpush3.msra.mxu1 %v1833_v39 }
 0x416   : > { %1600 = vmatprep.subr.mxu1 %v2132_v24 }
 0x417   : > { %v1083_v50 = vadd.f32 %v1843_v48, %v1082_v49  ;;  %1601 = vmatpush3.msra.mxu1 %v1829_v36 }
 0x418   : > { %1602 = vmatprep.subr.mxu1 %v2132_v24 }
 0x419   : > { %v1084_v51 = vadd.f32 %v1839_v44, %v1083_v50  ;;  %1603 = vmatpush3.msra.mxu1 %v1827_v35 }
 0x41a   : > { %1604 = vmatprep.subr.mxu1 %v2132_v24 }
 0x41b   : > { %v1085_v52 = vadd.f32 %v1835_v41, %v1084_v51  ;;  %1605 = vmatpush3.msra.mxu1 %v1825_v33 }
 0x41c   : > { %1606 = vmatprep.subr.mxu1 %v2132_v24 }
 0x41d   : > { %v1086_v53 = vadd.f32 %v1831_v38, %v1085_v52  ;;  %1607 = vmatpush3.msra.mxu1 %v1823_v31 }
 0x41e   : > { %1608 = vmatprep.subr.mxu1 %v2132_v24 }
 0x41f   : > { %v1087_v54 = vrot.slane %v1086_v53, 4  ;;  %1609 = vmatpush3.msra.mxu1 %v1821_v29 }
 0x420   : > { %1610 = vmatprep.subr.mxu1 %v2132_v24 }
 0x421   : > { %v1088_v55 = vadd.f32 %v1087_v54, %v1086_v53  ;;  %1611 = vmatpush3.msra.mxu1 %v1819_v18 }
 0x422   : > { %1612 = vmatprep.subr.mxu1 %v2132_v24 }
 0x423   : > { %v1089_v56 = vrot.slane %v1088_v55, 2  ;;  %1613 = vmatpush3.msra.mxu1 %v2585_v25 }
 0x424   : > { %1614 = vmatprep.subr.mxu1 %v2132_v24 }
 0x425   : > { %v1090_v57 = vadd.f32 %v1089_v56, %v1088_v55  ;;  %1615 = vmatpush3.msra.mxu1 %v2581_v22 }
 0x426   : > { %1616 = vmatprep.subr.mxu1 %v2132_v24 }
 0x427   : > { %v1091_v59 = vrot.slane %v1090_v57, 1  ;;  %1617 = vmatpush3.msra.mxu1 %v2578_v20 }
 0x428   : > { %1619 = vmatmul.mubr.f32.vlgmr.msra.gmra.mxu1 %v760_v63 }
 0x429   : > { %v1092_v62 = vadd.f32 %v1091_v59, %v1090_v57 }
 0x42b   : > { %v1093_v0 = vadd.f32 %v1092_v62, %v1071_v61 }
 0x42d   : > { %1094 = vst [vmem:[#allocation4] sm:$0x1] %v1093_v0 }
 0x4e7   : > { %1179 = sbr.rel (%p1435_p12) target bundleno = 1280 (0x500), region = 136 }
 0x4e8   : > { %v1169_v4 = vpop.f32.mrf.mxu1 }
 0x4e9   : > { %v1173_v6 = vadd.f32 %v1169_v4, %v1102_v2 }
 0x4ea   : > { %v1620_v7 = vpop.f32.mrf.mxu1 }
 0x4eb   : > { %1174 = vst [vmem:[#allocation5] sm:$0xff] %v1173_v6 }
 0x4ec   : > { %v1181_v3 = vld [vmem:[#allocation4] sm:$0x1] }
 0x4ed   : > { %1844 = vrcp.f32 %v1181_v3 }
 0x4f2   : > { %v1180_v8 = vld [vmem:[#allocation5] sm:$0xff] }
 0x4fa   : > { %v1845_v24 = vpop.eup %1844 }
 0x4fb   : > { %v1187_v9 = vrot.slane %v1845_v24, %v2565_v45 }
 0x4fd   : > { %v1189_v11 = vmul.f32 %v1187_v9, %v1180_v8 }
 0x4ff   : > { %1190 = vst [vmem:[%s484_s25] sm:$0xff] %v1189_v11 }
 0x500 PF: > { %s2795_s7 = sld [smem:[#allocation27_spill]]  ;;  %s1209_s30 = sshll.u32 %s484_s25, 4  ;;  %s1210_s30 = int_to_ptr.vmem [resolvable:$true] %s1209_s30 }
 0x501   : > { %s2796_s27 = sld [smem:[#allocation26_spill]]  ;;  %s1192_s6 = scalar_lea.sflag [#allocation8], %s482_s3 }
 0x502   : > { %s2797_s1 = sld [smem:[#allocation28_spill]]  ;;  %s1924_s20 = scalar_lea.vmem %s1210_s30, 128 }
 0x503   : > { %s2800_s23 = sld [smem:[#allocation48_spill]]  ;;  %p1925_p2 = scmp.ne.s32.totalorder %s1210_s30, %s1924_s20 }
 0x504   : > { %s2135_s17 = smov [#allocation14]  }
 0x505   : > { %p1926_p13 = pnand %p1925_p2, %p2360_p0  ;;  %s1928_s26 = sshll.u32 %s2135_s17, 4  ;;  %s1929_s26 = int_to_ptr.vmem [resolvable:$false] %s1928_s26 }
 0x506   : > { %s1437_s8 = sshll.u32 %s2795_s7, 1  ;;  %s1930_s29 = scalar_lea.vmem %s1929_s26, 256 }
 0x507   : > { %s1203_s13 = sadd.s32 %s2796_s27, %s1437_s8  ;;  %p1927_p1 = pneg %p1926_p13 }
 0x508   : > { %s1438_s14 = sshll.u32 %s2797_s1, 4  ;;  %p1931_p4 = scmp.lt.s32.totalorder %s1210_s30, %s1929_s26 }
 0x509   : > { %s1205_s4 = sadd.s32 %s1438_s14, %s1203_s13  ;;  %s2801_s16 = smov %s2800_s23 }
 0x50a   : > { %s1439_s0 = sshll.u32 %s1205_s4, 7  ;;  %p1932_p8 = scmp.lt.s32.totalorder %s1930_s29, %s1924_s20 }
 0x50b   : > { %s1207_s15 = scalar_lea.hbm %s2800_s23, %s1439_s0 }
 0x50c   : > { %p1933_p9 = por %p1932_p8, %p1931_p4 }
 0x50e   : > { %p1934_p5 = pnand %p1933_p9, %p1927_p1 }
 0x510   : > { %1937 = shalt.err (!%p1934_p5)
}
 0x511   : > { %s1938_s5 = scalar_lea.hbm %s1207_s15, 128  ;;  %s1942_s21 = scalar_lea.hbm %s2801_s16, 4096 }
 0x512   : > { %p1939_p10 = scmp.ne.s32.totalorder %s1207_s15, %s1938_s5  ;;  %p1943_p7 = scmp.lt.s32.totalorder %s1207_s15, %s2801_s16 }
 0x513   : > { %p1944_p12 = scmp.lt.s32.totalorder %s1942_s21, %s1938_s5 }
 0x514   : > { %p1940_p6 = pnand %p1939_p10, %p2360_p0 }
 0x515   : > { %p1945_p2 = por %p1944_p12, %p1943_p7 }
 0x516   : > { %p1941_p11 = pneg %p1940_p6 }
 0x518   : > { %p1946_p13 = pnand %p1945_p2, %p1941_p11 }
 0x51a   : > { %1949 = shalt.err (!%p1946_p13)
}
 0x51b   : > { %1630 = dma.vmem_to_hbm [thread:$0]  (%p2360_p0), %s1210_s30, 128, %s1207_s15, %s1192_s6  }
 0x51c PF: > { %s2802_s1 = sld [smem:[#allocation18_spill]]  ;;  %p1636_p1 = scmp.ge.s32.totalorder %s2120_s12, 2 }
 0x51e   : > { %p1633_p4 = pnand %p1636_p1, %p2364_p3 }
 0x520   : > { %p1634_p8 = pneg %p1633_p4 }
 0x522   : > { %s1221_s8 = sand.u32 1, %s2802_s1  }
 0x523   : > { %s1222_s13 = scalar_lea.sflag [#allocation8], %s1221_s8 }
 0x524   : > { %2039 = dma.done.wait (%p1634_p8), %s1222_s13, 128  }
 0x525   : > { %2041 = vsyncadd (%p1634_p8), %s1222_s13, 4294967168  ;;  %s24_s12 = sadd.s32 1, %s2120_s12   ;;  %s2805_s18 = sld [smem:[#allocation19_spill]] }
 0x526   : > { %p2642_p9 = scmp.ge.s32.totalorder %s24_s12, 66   ;;  %s2806_s19 = sld [smem:[#allocation20_spill]] }
 0x527   : > { %s2807_s20 = sld [smem:[#allocation41_spill]]  ;;  %s2820_s21 = smov %s2060_s22 }
 0x528   : > { %s2808_s4 = sld [smem:[#allocation38_spill]]  ;;  %s2822_s27 = smov %s2084_s28 }
 0x529   : > { %s2809_s23 = sld [smem:[#allocation22_spill]]  ;;  %s2825_s7 = smov %s2116_s11 }
 0x52a   : > { %s2810_s24 = sld [smem:[#allocation23_spill]] }
 0x52b   : > { %s2811_s25 = sld [smem:[#allocation40_spill]] }
 0x52c   : > { %s2812_s26 = sld [smem:[#allocation24_spill]] }
 0x52d   : > { %s2813_s30 = sld [smem:[#allocation39_spill]] }
 0x52e   : > { %s2814_s29 = sld [smem:[#allocation29_spill]]  ;;  %s2821_s22 = smov %s2808_s4 }
 0x52f   : > { %s2815_s6 = sld [smem:[#allocation30_spill]] }
 0x530   : > { %s2816_s8 = sld [smem:[#allocation32_spill]] }
 0x531   : > { %s2817_s0 = sld [smem:[#allocation33_spill]] }
 0x532   : > { %s2818_s10 = sld [smem:[#allocation35_spill]] }
 0x533   : > { %s2819_s15 = sld [smem:[#allocation37_spill]]  ;;  %s2823_s28 = smov %s2813_s30 }
 0x534   : > { %s2824_s30 = smov %s2108_s9 }
 0x535   :  { %23 = sbr.rel (!%p2642_p9) target bundleno = 21 (0x15), region = 213 }
 0x537   : > { %s2826_s9 = smov %s2817_s0 }
 0x539   : > { %s2827_s11 = smov %s2819_s15 }
 0x53a   :  { %1227 = vsyncpa [#allocation7], 1 }
 0x53b   :  { %1229 = vsyncpa [#allocation7 + $0x1], 1 }
 0x53c   :  { %1230 = vsyncpa [#allocation10], 1 }
 0x53d   :  { %1232 = vsyncpa [#allocation10 + $0x1], 1 }
 0x53e   :  { %1233 = vsyncpa [#allocation8], 1 }
 0x53f   :  { %1235 = vsyncpa [#allocation8 + $0x1], 1 }

</bundles_post_ra>
